<compile_context>
chip_gen: v6e
topology: v6e:2x2x1
jax: 0.10.0
libtpu: 0.0.40
codegen_flags: <defaults>
</compile_context>

<pallas_src>
import functools

import jax
import jax.numpy as jnp
from jax import lax
from jax.experimental import pallas as pl
from jax.experimental.pallas import tpu as pltpu


# ---------------------------------------------------------------------------
# Kernel 1: per-vocab-row scores = emb @ w  (reassociated linear layer).
# ---------------------------------------------------------------------------
def _scores_kernel(emb_ref, w_ref, out_ref):
    out_ref[...] = jnp.dot(emb_ref[...], w_ref[...],
                           preferred_element_type=jnp.float32)


def compute_scores(emb, w, *, stream_dtype=None, tile_v=1024,
                   tile_budget_bytes=8 << 20):
    """scores = emb @ w, V-tiled.  Cache the result across calls at inference."""
    V, D = emb.shape
    if stream_dtype is not None:
        # Memory-bound kernel: halving bytes read ~= 2x faster; keep f32 accumulate.
        emb = emb.astype(stream_dtype)
        w = w.astype(stream_dtype)
    itemsize = jnp.dtype(emb.dtype).itemsize

    # Double-buffered (tv, D) tile stays within ~tile_budget_bytes (v7x-safe).
    cap = max(8, (tile_budget_bytes // (2 * D * itemsize)) // 8 * 8)
    tv = min(tile_v, cap)
    if V <= tv:
        tv = V                      # whole (small) table as one block
    grid = (pl.cdiv(V, tv),)        # partial last block is masked by Pallas

    return pl.pallas_call(
        _scores_kernel,
        out_shape=jax.ShapeDtypeStruct((V, 1), jnp.float32),
        grid=grid,
        in_specs=[
            pl.BlockSpec((tv, D), lambda i: (i, 0)),   # emb tile (streamed)
            pl.BlockSpec((D, 1), lambda i: (0, 0)),    # weight (resident)
        ],
        out_specs=pl.BlockSpec((tv, 1), lambda i: (i, 0)),
        compiler_params=pltpu.CompilerParams(
            dimension_semantics=("parallel",),
            vmem_limit_bytes=32 * 1024 * 1024,         # explicit scoped-VMEM budget
        ),
    )(emb, w)


# ---------------------------------------------------------------------------
# Kernel 2: token-score lookup + mean pool + bias + sigmoid.
#   grid = (B tiles [parallel], V tiles [arbitrary, innermost reduction])
# ---------------------------------------------------------------------------
def _pool_score_kernel(idx_ref, scores_ref, b_ref, out_ref, acc_ref, *, vocab_size):
    vi = pl.program_id(1)

    @pl.when(vi == 0)
    def _():
        acc_ref[...] = jnp.zeros_like(acc_ref)

    S, tb = idx_ref.shape                         # (seq, batch-tile)
    tvc = scores_ref.shape[1]                     # vocab-tile width
    v0 = vi * tvc

    # Mask padded lanes of a partial scores block (avoid garbage * 0 -> NaN).
    lane_v = v0 + lax.broadcasted_iota(jnp.int32, (1, tvc), 1)
    svals = jnp.where(lane_v < vocab_size, scores_ref[...], 0.0)  # (1, tvc)

    # counts[j, b] = #{ s : idx[b, s] == v0 + j }   (vocab on sublanes, batch on lanes)
    v_ids = v0 + lax.broadcasted_iota(jnp.int32, (tvc, tb), 0)

    def body(s, c):
        row = idx_ref[pl.ds(s, 1), :]                             # (1, tb)
        return c + (row == v_ids).astype(jnp.float32)

    counts = lax.fori_loop(0, S, body,
                           jnp.zeros((tvc, tb), jnp.float32), unroll=True)

    # Reduction over this vocab tile on the MXU: (1, tvc) @ (tvc, tb) -> (1, tb).
    acc_ref[...] += jnp.dot(svals, counts, preferred_element_type=jnp.float32)

    @pl.when(vi == pl.num_programs(1) - 1)
    def _():
        logits = acc_ref[...] * (1.0 / S) + b_ref[0, 0]           # bias from SMEM
        z = jnp.exp(-jnp.abs(logits))                             # stable sigmoid
        out_ref[...] = jnp.where(logits >= 0.0, 1.0 / (1.0 + z), z / (1.0 + z))


def nlp_pallas_forward(idx, emb, w, b, scores=None, *,
                       stream_dtype=None, tile_v=1024,
                       tile_v_pool=512, tile_b=128):
    """Forward pass of NlpModel (prediction branch, y is None)."""
    B, S = idx.shape
    V, D = emb.shape

    if scores is None:
        scores = compute_scores(emb, w, stream_dtype=stream_dtype, tile_v=tile_v)

    scores_row = scores.reshape(1, V)               # lane-dense layout for kernel 2
    idx_t = jnp.asarray(idx, jnp.int32).T           # (S, B) — layout plumbing
    b2 = jnp.asarray(b, jnp.float32).reshape(1, 1)

    tb = B if B <= tile_b else tile_b
    tvc = V if V <= tile_v_pool else tile_v_pool
    grid = (pl.cdiv(B, tb), pl.cdiv(V, tvc))

    kernel = functools.partial(_pool_score_kernel, vocab_size=V)

    out_row = pl.pallas_call(
        kernel,
        out_shape=jax.ShapeDtypeStruct((1, B), jnp.float32),
        grid=grid,
        in_specs=[
            pl.BlockSpec((S, tb), lambda bi, vi: (0, bi)),          # token ids
            pl.BlockSpec((1, tvc), lambda bi, vi: (0, vi)),         # scores (lane-dense)
            pl.BlockSpec(memory_space=pltpu.MemorySpace.SMEM),      # bias scalar
        ],
        out_specs=pl.BlockSpec((1, tb), lambda bi, vi: (0, bi)),    # lane-dense output
        scratch_shapes=[pltpu.VMEM((1, tb), jnp.float32)],          # logits accumulator
        compiler_params=pltpu.CompilerParams(
            dimension_semantics=("parallel", "arbitrary"),
            vmem_limit_bytes=32 * 1024 * 1024,
        ),
    )(idx_t, scores_row, b2)

    return out_row.reshape(B, 1)


if __name__ == "__main__":
    # Small shapes consistent with the module's forward.
    batch = 2
    sentence_length = 8   # seq len == AvgPool1d kernel size
    text_dim = 32
    vocab_size = 16

    key = jax.random.PRNGKey(0)
    k_idx, k_emb, k_w, k_b = jax.random.split(key, 4)

    # Deterministic init (nn.Embedding ~ N(0,1); nn.Linear ~ U(-1/sqrt(D), 1/sqrt(D)))
    emb = jax.random.normal(k_emb, (vocab_size, text_dim), dtype=jnp.float32)
    bound = 1.0 / (text_dim ** 0.5)
    w = jax.random.uniform(k_w, (text_dim, 1), minval=-bound, maxval=bound,
                           dtype=jnp.float32)
    b = jax.random.uniform(k_b, (1, 1), minval=-bound, maxval=bound,
                           dtype=jnp.float32)

    idx = jax.random.randint(k_idx, (batch, sentence_length), 0, vocab_size,
                             dtype=jnp.int32)

    # Pure-JAX reference (embedding gather + mean pool + linear + sigmoid)
    ref = jax.nn.sigmoid(jnp.mean(emb[idx], axis=1) @ w + b[0])

    # 1) f32 path
    out = jax.block_until_ready(nlp_pallas_forward(idx, emb, w, b))
    assert out.shape == (batch, 1)
    assert jnp.allclose(out, ref, atol=1e-5), (out, ref)

    # 2) scores cached across calls (inference reuse: no full-table read per call)
    scores = jax.block_until_ready(compute_scores(emb, w))
    out_cached = jax.block_until_ready(
        nlp_pallas_forward(idx, emb, w, b, scores=scores))
    assert jnp.allclose(out_cached, out, atol=1e-6)

    # 3) bf16-streamed table read (memory-bound kernel 1), f32 accumulate
    out_bf16 = jax.block_until_ready(
        nlp_pallas_forward(idx, emb, w, b, stream_dtype=jnp.bfloat16))
    assert jnp.allclose(out_bf16, ref, atol=3e-2), (out_bf16, ref)

    # TODO(synk): the optional MSE-loss branch (y is not None) is training glue,
    # not a kernel path, and is not implemented here.
    print("KERNEL_OK")
</pallas_src>

<mosaic_0001>
module attributes {stable_mosaic.version = 11 : i64} {
  func.func @_scores_kernel(%arg0: i32, %arg1: memref<16x32xf32, #tpu.memory_space<vmem>>, %arg2: memref<32x1xf32, #tpu.memory_space<vmem>>, %arg3: memref<16x1xf32, #tpu.memory_space<vmem>>) attributes {dimension_semantics = [#tpu.dimension_semantics<parallel>], iteration_bounds = array<i64: 1>, scalar_prefetch = 0 : i64, scratch_operands = 0 : i64, tpu.core_type = #tpu.core_type<tc>, window_params = [{transform_indices = @transform_0, window_bounds = array<i64: 16, 32>}, {pipeline_mode = #tpu.pipeline_mode<synchronous>, transform_indices = @transform_1, window_bounds = array<i64: 32, 1>}, {transform_indices = @transform_2, window_bounds = array<i64: 16, 1>}]} {
    %c0 = arith.constant 0 : index
    %c0_0 = arith.constant 0 : index
    %0 = vector.load %arg1[%c0, %c0_0] : memref<16x32xf32, #tpu.memory_space<vmem>>, vector<16x32xf32>
    %c0_1 = arith.constant 0 : index
    %c0_2 = arith.constant 0 : index
    %1 = vector.load %arg2[%c0_1, %c0_2] : memref<32x1xf32, #tpu.memory_space<vmem>>, vector<32x1xf32>
    %cst = arith.constant dense<0.000000e+00> : vector<16x1xf32>
    %2 = tpu.matmul %0, %1, %cst {dimension_numbers = #tpu.dot_dimension_numbers<[1], [0], [0], [1], [0, 0, 1, 1], [], []>} : vector<16x32xf32>, vector<32x1xf32>, vector<16x1xf32> -> vector<16x1xf32>
    %c0_3 = arith.constant 0 : index
    %c0_4 = arith.constant 0 : index
    %3 = vector.load %arg3[%c0_3, %c0_4] : memref<16x1xf32, #tpu.memory_space<vmem>>, vector<16x1xf32>
    tpu.vector_store %arg3[%c0_3, %c0_4], %2 {strides = array<i32>} : memref<16x1xf32, #tpu.memory_space<vmem>>, vector<16x1xf32>,
    return
  }
  func.func @transform_0(%arg0: i32) -> (i32, i32) {
    %c0_i32 = arith.constant 0 : i32
    %c0_i32_0 = arith.constant 0 : i32
    return %arg0, %c0_i32 : i32, i32
  }
  func.func @transform_1(%arg0: i32) -> (i32, i32) {
    %c0_i32 = arith.constant 0 : i32
    %c0_i32_0 = arith.constant 0 : i32
    %c0_i32_1 = arith.constant 0 : i32
    return %c0_i32, %c0_i32_0 : i32, i32
  }
  func.func @transform_2(%arg0: i32) -> (i32, i32) {
    %c0_i32 = arith.constant 0 : i32
    %c0_i32_0 = arith.constant 0 : i32
    return %arg0, %c0_i32 : i32, i32
  }
}

</mosaic_0001>

<bundles_post_ra>
// kernel: tpu_custom_call.1
= control target key start
LH: loop header
LB: loop body
LE: loop exit
PB: predicated region body
PF: predicated region fallthrough
CT: control target
= control target key end

     0   :  { %vm17_vm0 = vcmask 261120   ;;  %vm99_vm1 = vcmask 7168   ;;  %s166_s1 = inlined_call_operand.vmem [shape: f32[32,1], index: 1, kind: input, shape index: {}]   ;;  %s167_s0 = inlined_call_operand.vmem [shape: f32[16,32], index: 0, kind: input, shape index: {}]   ;;  %s168_s2 = inlined_call_operand.vmem [shape: f32[16,1], index: 2, kind: output, shape index: {}]  }
   0x1   :  { %v16_v0 = vld [vmem:[%s166_s1 + $0x18] sm:$0xff]  ;;  %v15_v1 = vld [vmem:[%s166_s1 + $0x10] sm:$0xff]  ;;  %v11_v2 = vld [vmem:[%s167_s0] sm:$0xff] }
   0x2   :  { %114 = vmatprep.subr.mxu0 %v16_v0  ;;  %v14_v3 = vld [vmem:[%s166_s1 + $0x8] sm:$0xff]  ;;  %122 = vmatprep.mubr.msk.f32.mxu0 %vm17_vm0, %v11_v2  ;;  %v13_v4 = vld [vmem:[%s166_s1] sm:$0xff] }
   0x3   :  { %115 = vmatpush3.msra.mxu0 %v16_v0  ;;  %v12_v5 = vld [vmem:[%s167_s0 + $0x8] sm:$0xff] }
   0x4   :  { %116 = vmatprep.subr.mxu0 %v15_v1 }
   0x5   :  { %117 = vmatpush3.msra.mxu0 %v15_v1 }
   0x6   :  { %118 = vmatprep.subr.mxu0 %v14_v3 }
   0x7   :  { %119 = vmatpush3.msra.mxu0 %v14_v3 }
   0x8   :  { %120 = vmatprep.subr.mxu0 %v13_v4 }
   0x9   :  { %121 = vmatpush3.msra.mxu0 %v13_v4 }
   0xa   :  { %123 = vmatmul.mubr.msk.f32.vlgmr.msra.gmra.mxu0 %vm17_vm0, %v12_v5 }
  0xca   :  { %v124_v6 = vpop.f32.mrf.mxu0 }
  0xcb   :  { %101 = vst.msk [vmem:[%s168_s2 + $0x8] sm:$0xff] %vm99_vm1, %v124_v6 }
  0xcc   :  { %v90_v7 = vpop.f32.mrf.mxu0 }
  0xcd   :  { %100 = vst.msk [vmem:[%s168_s2] sm:$0xff] %vm99_vm1, %v90_v7 }

</bundles_post_ra>
